<compile_context>
chip_gen: v5e
topology: v5e:2x2
jax: 0.10.0
libtpu: 0.0.40
codegen_flags: <defaults>
</compile_context>

<pallas_src>
import functools

import jax
import jax.numpy as jnp
from jax.experimental import pallas as pl
from jax.experimental.pallas import tpu as pltpu


def _birnn_fused_kernel(xf_ref, xb_ref, wxh_ref, whh_ref, b_ref, h0_ref,
                        of_ref, ob_ref,
                        hf_ref, hb_ref, xpf_ref, xpb_ref, *, n_pad):
    """One grid step = one time chunk, BOTH directions.

    Forward processes chunk t (rows 0..TT-1 in time order); backward processes
    chunk NC-1-t (rows TT-1..0, i.e. global reverse time order).  The two
    recurrences are independent chains in one basic block -> the scheduler
    interleaves their MXU pushes and EUP tanh's.
    """
    t = pl.program_id(0)
    TT, B, Hp = of_ref.shape

    # Seed both recurrent states at the first grid step.
    @pl.when(t == 0)
    def _():
        hf_ref[...] = h0_ref[0]
        hb_ref[...] = h0_ref[1]

    wxh_f, wxh_b = wxh_ref[0], wxh_ref[1]        # (D,  Hp)  compute dtype
    whh_f, whh_b = whh_ref[0], whh_ref[1]        # (Hp, Hp)
    cdt = whh_f.dtype
    bias_f = b_ref[0]                            # (1, Hp) f32, broadcasts
    bias_b = b_ref[1]

    # --- chunk-level input projection: one big matmul per direction ---------
    # (TT*B, D) x (D, Hp): a single MXU push per direction instead of TT tiny
    # M=B pushes; independent of the recurrence, so it acts as filler for the
    # serial chain below (same basic block).
    xpf_ref[...] = (jnp.dot(xf_ref[0], wxh_f,
                            preferred_element_type=jnp.float32) + bias_f)
    xpb_ref[...] = (jnp.dot(xb_ref[0], wxh_b,
                            preferred_element_type=jnp.float32) + bias_b)

    # --- interleaved serial recurrences (f32 carries) ------------------------
    h_f = hf_ref[...]
    h_b = hb_ref[...]
    for i in range(TT):
        jb = TT - 1 - i                          # backward walks its chunk in reverse
        nf = jnp.tanh(xpf_ref[pl.ds(i * B, B), :]
                      + jnp.dot(h_f.astype(cdt), whh_f,
                                preferred_element_type=jnp.float32))
        nb = jnp.tanh(xpb_ref[pl.ds(jb * B, B), :]
                      + jnp.dot(h_b.astype(cdt), whh_b,
                                preferred_element_type=jnp.float32))
        h_f = nf
        if n_pad and jb >= TT - n_pad:
            # Row jb of the LAST chunk is zero padding; the backward direction
            # visits that chunk only at grid step 0 -> keep its state unchanged
            # there (static per-row check, dynamic only on t == 0).
            h_b = jnp.where(t == 0, h_b, nb)
        else:
            h_b = nb
        of_ref[i] = h_f.astype(of_ref.dtype)     # forward, time-aligned row i
        ob_ref[jb] = h_b.astype(ob_ref.dtype)    # backward, time-aligned row jb
    hf_ref[...] = h_f
    hb_ref[...] = h_b


def _round_up(x, m):
    return (x + m - 1) // m * m


def birnn_scratch_forward(inputs, params, Hs=None, *,
                          compute_dtype=jnp.bfloat16, time_chunk=32,
                          out_dtype=jnp.float32):
    """inputs: (T, B, D) float32. Returns (outputs (T, B, 2H), (f_H, b_H))."""
    T, B, D = inputs.shape
    W_xh_f, W_hh_f, b_h_f, W_xh_b, W_hh_b, b_h_b = params
    H = W_hh_f.shape[0]

    # Lane-dense hidden width: padded weight/bias/h0 columns are zero, so the
    # padded hidden lanes stay exactly zero through tanh(0) = 0.
    Hp = _round_up(H, 128)
    ph = Hp - H
    TT = max(1, min(int(time_chunk), T))
    NC = -(-T // TT)                  # ceil-div; T padded up to NC*TT
    Tp = NC * TT
    n_pad = Tp - T
    f32 = jnp.float32

    W_xh = jnp.stack([jnp.pad(W_xh_f, ((0, 0), (0, ph))),
                      jnp.pad(W_xh_b, ((0, 0), (0, ph)))]).astype(compute_dtype)
    W_hh = jnp.stack([jnp.pad(W_hh_f, ((0, ph), (0, ph))),
                      jnp.pad(W_hh_b, ((0, ph), (0, ph)))]).astype(compute_dtype)
    b = jnp.stack([jnp.pad(b_h_f, (0, ph)),
                   jnp.pad(b_h_b, (0, ph))]).reshape(2, 1, Hp).astype(f32)
    if Hs is None:
        h0 = jnp.zeros((2, B, Hp), f32)
    else:
        f_H0, b_H0 = Hs
        h0 = jnp.stack([jnp.pad(f_H0.astype(f32), ((0, 0), (0, ph))),
                        jnp.pad(b_H0.astype(f32), ((0, 0), (0, ph)))])

    x = inputs.astype(compute_dtype)
    if n_pad:
        x = jnp.pad(x, ((0, n_pad), (0, 0), (0, 0)))   # zero rows at the end
    # Free row-major regrouping so the kernel gets a (TT*B, D) slab directly
    # (no in-kernel reshape needed for the chunk-level projection matmul).
    x = x.reshape(NC, TT * B, D)

    grid_spec = pltpu.PrefetchScalarGridSpec(
        num_scalar_prefetch=0,
        grid=(NC,),                                      # sequential time chunks
        in_specs=[
            pl.BlockSpec((1, TT * B, D), lambda t: (t, 0, 0)),            # X, forward chunk
            pl.BlockSpec((1, TT * B, D), lambda t: (NC - 1 - t, 0, 0)),   # X, backward chunk
            pl.BlockSpec((2, D, Hp), lambda t: (0, 0, 0)),                # W_xh (both dirs)
            pl.BlockSpec((2, Hp, Hp), lambda t: (0, 0, 0)),               # W_hh (both dirs)
            pl.BlockSpec((2, 1, Hp), lambda t: (0, 0, 0)),                # biases
            pl.BlockSpec((2, B, Hp), lambda t: (0, 0, 0)),                # initial states
        ],
        out_specs=[
            pl.BlockSpec((TT, B, Hp), lambda t: (t, 0, 0)),               # forward outputs
            pl.BlockSpec((TT, B, Hp), lambda t: (NC - 1 - t, 0, 0)),      # backward outputs (time-aligned)
        ],
        scratch_shapes=[
            pltpu.VMEM((B, Hp), f32),            # forward recurrent state
            pltpu.VMEM((B, Hp), f32),            # backward recurrent state
            pltpu.VMEM((TT * B, Hp), f32),       # forward chunk projection
            pltpu.VMEM((TT * B, Hp), f32),       # backward chunk projection
        ],
    )

    out_f, out_b = pl.pallas_call(
        functools.partial(_birnn_fused_kernel, n_pad=n_pad),
        out_shape=(jax.ShapeDtypeStruct((Tp, B, Hp), out_dtype),
                   jax.ShapeDtypeStruct((Tp, B, Hp), out_dtype)),
        grid_spec=grid_spec,
        compiler_params=pltpu.CompilerParams(
            dimension_semantics=("arbitrary",)),
    )(x, x, W_xh, W_hh, b, h0)

    out_f = out_f[:T, :, :H]
    out_b = out_b[:T, :, :H]
    outputs = jnp.concatenate([out_f, out_b], axis=-1)   # single lane-concat pass
    f_H = out_f[T - 1]        # forward state after the last timestep
    b_H = out_b[0]            # backward state after processing X[0]
    return outputs, (f_H, b_H)


# ----------------------------- reference & tests -----------------------------

def _init_params(key, num_inputs, num_hiddens, sigma=0.01):
    kf1, kf2, kb1, kb2 = jax.random.split(key, 4)
    W_xh_f = sigma * jax.random.normal(kf1, (num_inputs, num_hiddens), jnp.float32)
    W_hh_f = sigma * jax.random.normal(kf2, (num_hiddens, num_hiddens), jnp.float32)
    b_h_f = jnp.zeros((num_hiddens,), jnp.float32)
    W_xh_b = sigma * jax.random.normal(kb1, (num_inputs, num_hiddens), jnp.float32)
    W_hh_b = sigma * jax.random.normal(kb2, (num_hiddens, num_hiddens), jnp.float32)
    b_h_b = jnp.zeros((num_hiddens,), jnp.float32)
    return (W_xh_f, W_hh_f, b_h_f, W_xh_b, W_hh_b, b_h_b)


def _rnn_ref(X, W_xh, W_hh, b_h, h0=None):
    def step(h, x):
        h = jnp.tanh(x @ W_xh + h @ W_hh + b_h)
        return h, h
    if h0 is None:
        h0 = jnp.zeros((X.shape[1], W_hh.shape[0]), X.dtype)
    _, outs = jax.lax.scan(step, h0, X)
    return outs


def _birnn_ref(X, params, Hs=None):
    W_xh_f, W_hh_f, b_h_f, W_xh_b, W_hh_b, b_h_b = params
    f_h0, b_h0 = Hs if Hs is not None else (None, None)
    f_outs = _rnn_ref(X, W_xh_f, W_hh_f, b_h_f, f_h0)
    b_outs = _rnn_ref(X[::-1], W_xh_b, W_hh_b, b_h_b, b_h0)
    outputs = jnp.concatenate([f_outs, b_outs[::-1]], axis=-1)
    return outputs, (f_outs[-1], b_outs[-1])


if __name__ == "__main__":
    base_key = jax.random.PRNGKey(0)

    def check(idx, tag, T, B, D, H, *, compute_dtype, time_chunk, with_hs,
              atol, rtol):
        kp, kx, kh1, kh2 = jax.random.split(jax.random.fold_in(base_key, idx), 4)
        params = _init_params(kp, D, H, sigma=0.01)
        inputs = jax.random.normal(kx, (T, B, D), jnp.float32)
        Hs = None
        if with_hs:
            Hs = (0.1 * jax.random.normal(kh1, (B, H), jnp.float32),
                  0.1 * jax.random.normal(kh2, (B, H), jnp.float32))

        outputs, (f_H, b_H) = birnn_scratch_forward(
            inputs, params, Hs, compute_dtype=compute_dtype,
            time_chunk=time_chunk)
        jax.block_until_ready(outputs)
        jax.block_until_ready(f_H)
        jax.block_until_ready(b_H)

        ref_out, (ref_fH, ref_bH) = _birnn_ref(inputs, params, Hs)
        assert outputs.shape == (T, B, 2 * H), (tag, outputs.shape)
        assert jnp.allclose(outputs, ref_out, atol=atol, rtol=rtol), tag
        assert jnp.allclose(f_H, ref_fH, atol=atol, rtol=rtol), tag
        assert jnp.allclose(b_H, ref_bH, atol=atol, rtol=rtol), tag

    # 1) lane-aligned H, bf16 compute (default fast path), single chunk.
    check(1, "bf16_h128", T=8, B=8, D=16, H=128,
          compute_dtype=jnp.bfloat16, time_chunk=8, with_hs=False,
          atol=2e-2, rtol=2e-2)
    # 2) lane-aligned H, f32 compute, two chunks (fused directions cross over).
    check(2, "f32_h128_chunked", T=8, B=8, D=16, H=128,
          compute_dtype=jnp.float32, time_chunk=4, with_hs=False,
          atol=1e-5, rtol=1e-5)
    # 3) small H (lane-padding path), ragged T (time-padding + backward mask),
    #    user-provided initial states Hs.
    check(3, "f32_h32_hs_raggedT", T=9, B=4, D=16, H=32,
          compute_dtype=jnp.float32, time_chunk=4, with_hs=True,
          atol=1e-5, rtol=1e-5)

    print("KERNEL_OK")
</pallas_src>

<mosaic_0001>
module attributes {stable_mosaic.version = 11 : i64} {
  func.func @_birnn_fused_kernel(%arg0: i32, %arg1: memref<1x64x16xbf16, #tpu.memory_space<vmem>>, %arg2: memref<1x64x16xbf16, #tpu.memory_space<vmem>>, %arg3: memref<2x16x128xbf16, #tpu.memory_space<vmem>>, %arg4: memref<2x128x128xbf16, #tpu.memory_space<vmem>>, %arg5: memref<2x1x128xf32, #tpu.memory_space<vmem>>, %arg6: memref<2x8x128xf32, #tpu.memory_space<vmem>>, %arg7: memref<8x8x128xf32, #tpu.memory_space<vmem>>, %arg8: memref<8x8x128xf32, #tpu.memory_space<vmem>>, %arg9: memref<8x128xf32, #tpu.memory_space<vmem>>, %arg10: memref<8x128xf32, #tpu.memory_space<vmem>>, %arg11: memref<64x128xf32, #tpu.memory_space<vmem>>, %arg12: memref<64x128xf32, #tpu.memory_space<vmem>>) attributes {dimension_semantics = [#tpu.dimension_semantics<arbitrary>], iteration_bounds = array<i64: 1>, scalar_prefetch = 0 : i64, scratch_operands = 4 : i64, tpu.core_type = #tpu.core_type<tc>, window_params = [{transform_indices = @transform_0, window_bounds = array<i64: 1, 64, 16>}, {transform_indices = @transform_1, window_bounds = array<i64: 1, 64, 16>}, {pipeline_mode = #tpu.pipeline_mode<synchronous>, transform_indices = @transform_2, window_bounds = array<i64: 2, 16, 128>}, {pipeline_mode = #tpu.pipeline_mode<synchronous>, transform_indices = @transform_3, window_bounds = array<i64: 2, 128, 128>}, {pipeline_mode = #tpu.pipeline_mode<synchronous>, transform_indices = @transform_4, window_bounds = array<i64: 2, 1, 128>}, {pipeline_mode = #tpu.pipeline_mode<synchronous>, transform_indices = @transform_5, window_bounds = array<i64: 2, 8, 128>}, {transform_indices = @transform_6, window_bounds = array<i64: 8, 8, 128>}, {transform_indices = @transform_7, window_bounds = array<i64: 8, 8, 128>}]} {
    %c0_i32 = arith.constant 0 : i32
    %0 = arith.cmpi eq, %arg0, %c0_i32 : i32
    %1 = arith.extui %0 : i1 to i32
    %c0_i32_0 = arith.constant 0 : i32
    %2 = arith.cmpi ne, %1, %c0_i32_0 : i32
    scf.if %2 {
      %c0_119 = arith.constant 0 : index
      %c0_120 = arith.constant 0 : index
      %c0_121 = arith.constant 0 : index
      %159 = vector.load %arg6[%c0_119, %c0_120, %c0_121] : memref<2x8x128xf32, #tpu.memory_space<vmem>>, vector<1x8x128xf32>
      %160 = vector.shape_cast %159 : vector<1x8x128xf32> to vector<8x128xf32>
      %c0_122 = arith.constant 0 : index
      %c0_123 = arith.constant 0 : index
      %161 = vector.load %arg9[%c0_122, %c0_123] : memref<8x128xf32, #tpu.memory_space<vmem>>, vector<8x128xf32>
      tpu.vector_store %arg9[%c0_122, %c0_123], %160 {strides = array<i32>} : memref<8x128xf32, #tpu.memory_space<vmem>>, vector<8x128xf32>,
      %c1_124 = arith.constant 1 : index
      %c0_125 = arith.constant 0 : index
      %c0_126 = arith.constant 0 : index
      %162 = vector.load %arg6[%c1_124, %c0_125, %c0_126] : memref<2x8x128xf32, #tpu.memory_space<vmem>>, vector<1x8x128xf32>
      %163 = vector.shape_cast %162 : vector<1x8x128xf32> to vector<8x128xf32>
      %c0_127 = arith.constant 0 : index
      %c0_128 = arith.constant 0 : index
      %164 = vector.load %arg10[%c0_127, %c0_128] : memref<8x128xf32, #tpu.memory_space<vmem>>, vector<8x128xf32>
      tpu.vector_store %arg10[%c0_127, %c0_128], %163 {strides = array<i32>} : memref<8x128xf32, #tpu.memory_space<vmem>>, vector<8x128xf32>,
    } else {
    }
    %c0 = arith.constant 0 : index
    %c0_1 = arith.constant 0 : index
    %c0_2 = arith.constant 0 : index
    %3 = vector.load %arg3[%c0, %c0_1, %c0_2] : memref<2x16x128xbf16, #tpu.memory_space<vmem>>, vector<1x16x128xbf16>
    %4 = vector.shape_cast %3 : vector<1x16x128xbf16> to vector<16x128xbf16>
    %c1 = arith.constant 1 : index
    %c0_3 = arith.constant 0 : index
    %c0_4 = arith.constant 0 : index
    %5 = vector.load %arg3[%c1, %c0_3, %c0_4] : memref<2x16x128xbf16, #tpu.memory_space<vmem>>, vector<1x16x128xbf16>
    %6 = vector.shape_cast %5 : vector<1x16x128xbf16> to vector<16x128xbf16>
    %c0_5 = arith.constant 0 : index
    %c0_6 = arith.constant 0 : index
    %c0_7 = arith.constant 0 : index
    %7 = vector.load %arg4[%c0_5, %c0_6, %c0_7] : memref<2x128x128xbf16, #tpu.memory_space<vmem>>, vector<1x128x128xbf16>
    %8 = vector.shape_cast %7 : vector<1x128x128xbf16> to vector<128x128xbf16>
    %c1_8 = arith.constant 1 : index
    %c0_9 = arith.constant 0 : index
    %c0_10 = arith.constant 0 : index
    %9 = vector.load %arg4[%c1_8, %c0_9, %c0_10] : memref<2x128x128xbf16, #tpu.memory_space<vmem>>, vector<1x128x128xbf16>
    %10 = vector.shape_cast %9 : vector<1x128x128xbf16> to vector<128x128xbf16>
    %c0_11 = arith.constant 0 : index
    %c0_12 = arith.constant 0 : index
    %c0_13 = arith.constant 0 : index
    %11 = vector.load %arg5[%c0_11, %c0_12, %c0_13] : memref<2x1x128xf32, #tpu.memory_space<vmem>>, vector<1x1x128xf32>
    %12 = vector.shape_cast %11 : vector<1x1x128xf32> to vector<1x128xf32>
    %c1_14 = arith.constant 1 : index
    %c0_15 = arith.constant 0 : index
    %c0_16 = arith.constant 0 : index
    %13 = vector.load %arg5[%c1_14, %c0_15, %c0_16] : memref<2x1x128xf32, #tpu.memory_space<vmem>>, vector<1x1x128xf32>
    %14 = vector.shape_cast %13 : vector<1x1x128xf32> to vector<1x128xf32>
    %c0_17 = arith.constant 0 : index
    %c0_18 = arith.constant 0 : index
    %c0_19 = arith.constant 0 : index
    %15 = vector.load %arg1[%c0_17, %c0_18, %c0_19] : memref<1x64x16xbf16, #tpu.memory_space<vmem>>, vector<1x64x16xbf16>
    %16 = vector.shape_cast %15 : vector<1x64x16xbf16> to vector<64x16xbf16>
    %cst = arith.constant dense<0.000000e+00> : vector<64x128xf32>
    %17 = tpu.matmul %16, %4, %cst {dimension_numbers = #tpu.dot_dimension_numbers<[1], [0], [0], [1], [0, 0, 1, 1], [], []>} : vector<64x16xbf16>, vector<16x128xbf16>, vector<64x128xf32> -> vector<64x128xf32>
    %18 = vector.broadcast %12 : vector<1x128xf32> to vector<64x128xf32>
    %19 = arith.addf %17, %18 : vector<64x128xf32>
    %c0_20 = arith.constant 0 : index
    %c0_21 = arith.constant 0 : index
    %20 = vector.load %arg11[%c0_20, %c0_21] : memref<64x128xf32, #tpu.memory_space<vmem>>, vector<64x128xf32>
    tpu.vector_store %arg11[%c0_20, %c0_21], %19 {strides = array<i32>} : memref<64x128xf32, #tpu.memory_space<vmem>>, vector<64x128xf32>,
    %c0_22 = arith.constant 0 : index
    %c0_23 = arith.constant 0 : index
    %c0_24 = arith.constant 0 : index
    %21 = vector.load %arg2[%c0_22, %c0_23, %c0_24] : memref<1x64x16xbf16, #tpu.memory_space<vmem>>, vector<1x64x16xbf16>
    %22 = vector.shape_cast %21 : vector<1x64x16xbf16> to vector<64x16xbf16>
    %cst_25 = arith.constant dense<0.000000e+00> : vector<64x128xf32>
    %23 = tpu.matmul %22, %6, %cst_25 {dimension_numbers = #tpu.dot_dimension_numbers<[1], [0], [0], [1], [0, 0, 1, 1], [], []>} : vector<64x16xbf16>, vector<16x128xbf16>, vector<64x128xf32> -> vector<64x128xf32>
    %24 = vector.broadcast %14 : vector<1x128xf32> to vector<64x128xf32>
    %25 = arith.addf %23, %24 : vector<64x128xf32>
    %c0_26 = arith.constant 0 : index
    %c0_27 = arith.constant 0 : index
    %26 = vector.load %arg12[%c0_26, %c0_27] : memref<64x128xf32, #tpu.memory_space<vmem>>, vector<64x128xf32>
    tpu.vector_store %arg12[%c0_26, %c0_27], %25 {strides = array<i32>} : memref<64x128xf32, #tpu.memory_space<vmem>>, vector<64x128xf32>,
    %c0_28 = arith.constant 0 : index
    %c0_29 = arith.constant 0 : index
    %27 = vector.load %arg9[%c0_28, %c0_29] : memref<8x128xf32, #tpu.memory_space<vmem>>, vector<8x128xf32>
    %c0_30 = arith.constant 0 : index
    %c0_31 = arith.constant 0 : index
    %28 = vector.load %arg10[%c0_30, %c0_31] : memref<8x128xf32, #tpu.memory_space<vmem>>, vector<8x128xf32>
    %c0_32 = arith.constant 0 : index
    %c0_33 = arith.constant 0 : index
    %29 = vector.load %arg11[%c0_32, %c0_33] : memref<64x128xf32, #tpu.memory_space<vmem>>, vector<8x128xf32>
    %30 = arith.truncf %27 : vector<8x128xf32> to vector<8x128xbf16>
    %cst_34 = arith.constant dense<0.000000e+00> : vector<8x128xf32>
    %31 = tpu.matmul %30, %8, %cst_34 {dimension_numbers = #tpu.dot_dimension_numbers<[1], [0], [0], [1], [0, 0, 1, 1], [], []>} : vector<8x128xbf16>, vector<128x128xbf16>, vector<8x128xf32> -> vector<8x128xf32>
    %32 = arith.addf %29, %31 : vector<8x128xf32>
    %33 = math.tanh %32 : vector<8x128xf32>
    %c56 = arith.constant 56 : index
    %c0_35 = arith.constant 0 : index
    %34 = vector.load %arg12[%c56, %c0_35] : memref<64x128xf32, #tpu.memory_space<vmem>>, vector<8x128xf32>
    %35 = arith.truncf %28 : vector<8x128xf32> to vector<8x128xbf16>
    %cst_36 = arith.constant dense<0.000000e+00> : vector<8x128xf32>
    %36 = tpu.matmul %35, %10, %cst_36 {dimension_numbers = #tpu.dot_dimension_numbers<[1], [0], [0], [1], [0, 0, 1, 1], [], []>} : vector<8x128xbf16>, vector<128x128xbf16>, vector<8x128xf32> -> vector<8x128xf32>
    %37 = arith.addf %34, %36 : vector<8x128xf32>
    %38 = math.tanh %37 : vector<8x128xf32>
    %c0_37 = arith.constant 0 : index
    %c0_38 = arith.constant 0 : index
    %c0_39 = arith.constant 0 : index
    %39 = vector.load %arg7[%c0_37, %c0_38, %c0_39] : memref<8x8x128xf32, #tpu.memory_space<vmem>>, vector<1x8x128xf32>
    %40 = vector.shape_cast %39 : vector<1x8x128xf32> to vector<8x128xf32>
    %41 = vector.shape_cast %33 : vector<8x128xf32> to vector<1x8x128xf32>
    tpu.vector_store %arg7[%c0_37, %c0_38, %c0_39], %41 {strides = array<i32>} : memref<8x8x128xf32, #tpu.memory_space<vmem>>, vector<1x8x128xf32>,
    %c7 = arith.constant 7 : index
    %c0_40 = arith.constant 0 : index
    %c0_41 = arith.constant 0 : index
    %42 = vector.load %arg8[%c7, %c0_40, %c0_41] : memref<8x8x128xf32, #tpu.memory_space<vmem>>, vector<1x8x128xf32>
    %43 = vector.shape_cast %42 : vector<1x8x128xf32> to vector<8x128xf32>
    %44 = vector.shape_cast %38 : vector<8x128xf32> to vector<1x8x128xf32>
    tpu.vector_store %arg8[%c7, %c0_40, %c0_41], %44 {strides = array<i32>} : memref<8x8x128xf32, #tpu.memory_space<vmem>>, vector<1x8x128xf32>,
    %c8 = arith.constant 8 : index
    %c0_42 = arith.constant 0 : index
    %45 = vector.load %arg11[%c8, %c0_42] : memref<64x128xf32, #tpu.memory_space<vmem>>, vector<8x128xf32>
    %46 = arith.truncf %33 : vector<8x128xf32> to vector<8x128xbf16>
    %cst_43 = arith.constant dense<0.000000e+00> : vector<8x128xf32>
    %47 = tpu.matmul %46, %8, %cst_43 {dimension_numbers = #tpu.dot_dimension_numbers<[1], [0], [0], [1], [0, 0, 1, 1], [], []>} : vector<8x128xbf16>, vector<128x128xbf16>, vector<8x128xf32> -> vector<8x128xf32>
    %48 = arith.addf %45, %47 : vector<8x128xf32>
    %49 = math.tanh %48 : vector<8x128xf32>
    %c48 = arith.constant 48 : index
    %c0_44 = arith.constant 0 : index
    %50 = vector.load %arg12[%c48, %c0_44] : memref<64x128xf32, #tpu.memory_space<vmem>>, vector<8x128xf32>
    %51 = arith.truncf %38 : vector<8x128xf32> to vector<8x128xbf16>
    %cst_45 = arith.constant dense<0.000000e+00> : vector<8x128xf32>
    %52 = tpu.matmul %51, %10, %cst_45 {dimension_numbers = #tpu.dot_dimension_numbers<[1], [0], [0], [1], [0, 0, 1, 1], [], []>} : vector<8x128xbf16>, vector<128x128xbf16>, vector<8x128xf32> -> vector<8x128xf32>
    %53 = arith.addf %50, %52 : vector<8x128xf32>
    %54 = math.tanh %53 : vector<8x128xf32>
    %c1_46 = arith.constant 1 : index
    %c0_47 = arith.constant 0 : index
    %c0_48 = arith.constant 0 : index
    %55 = vector.load %arg7[%c1_46, %c0_47, %c0_48] : memref<8x8x128xf32, #tpu.memory_space<vmem>>, vector<1x8x128xf32>
    %56 = vector.shape_cast %55 : vector<1x8x128xf32> to vector<8x128xf32>
    %57 = vector.shape_cast %49 : vector<8x128xf32> to vector<1x8x128xf32>
    tpu.vector_store %arg7[%c1_46, %c0_47, %c0_48], %57 {strides = array<i32>} : memref<8x8x128xf32, #tpu.memory_space<vmem>>, vector<1x8x128xf32>,
    %c6 = arith.constant 6 : index
    %c0_49 = arith.constant 0 : index
    %c0_50 = arith.constant 0 : index
    %58 = vector.load %arg8[%c6, %c0_49, %c0_50] : memref<8x8x128xf32, #tpu.memory_space<vmem>>, vector<1x8x128xf32>
    %59 = vector.shape_cast %58 : vector<1x8x128xf32> to vector<8x128xf32>
    %60 = vector.shape_cast %54 : vector<8x128xf32> to vector<1x8x128xf32>
    tpu.vector_store %arg8[%c6, %c0_49, %c0_50], %60 {strides = array<i32>} : memref<8x8x128xf32, #tpu.memory_space<vmem>>, vector<1x8x128xf32>,
    %c16 = arith.constant 16 : index
    %c0_51 = arith.constant 0 : index
    %61 = vector.load %arg11[%c16, %c0_51] : memref<64x128xf32, #tpu.memory_space<vmem>>, vector<8x128xf32>
    %62 = arith.truncf %49 : vector<8x128xf32> to vector<8x128xbf16>
    %cst_52 = arith.constant dense<0.000000e+00> : vector<8x128xf32>
    %63 = tpu.matmul %62, %8, %cst_52 {dimension_numbers = #tpu.dot_dimension_numbers<[1], [0], [0], [1], [0, 0, 1, 1], [], []>} : vector<8x128xbf16>, vector<128x128xbf16>, vector<8x128xf32> -> vector<8x128xf32>
    %64 = arith.addf %61, %63 : vector<8x128xf32>
    %65 = math.tanh %64 : vector<8x128xf32>
    %c40 = arith.constant 40 : index
    %c0_53 = arith.constant 0 : index
    %66 = vector.load %arg12[%c40, %c0_53] : memref<64x128xf32, #tpu.memory_space<vmem>>, vector<8x128xf32>
    %67 = arith.truncf %54 : vector<8x128xf32> to vector<8x128xbf16>
    %cst_54 = arith.constant dense<0.000000e+00> : vector<8x128xf32>
    %68 = tpu.matmul %67, %10, %cst_54 {dimension_numbers = #tpu.dot_dimension_numbers<[1], [0], [0], [1], [0, 0, 1, 1], [], []>} : vector<8x128xbf16>, vector<128x128xbf16>, vector<8x128xf32> -> vector<8x128xf32>
    %69 = arith.addf %66, %68 : vector<8x128xf32>
    %70 = math.tanh %69 : vector<8x128xf32>
    %c2 = arith.constant 2 : index
    %c0_55 = arith.constant 0 : index
    %c0_56 = arith.constant 0 : index
    %71 = vector.load %arg7[%c2, %c0_55, %c0_56] : memref<8x8x128xf32, #tpu.memory_space<vmem>>, vector<1x8x128xf32>
    %72 = vector.shape_cast %71 : vector<1x8x128xf32> to vector<8x128xf32>
    %73 = vector.shape_cast %65 : vector<8x128xf32> to vector<1x8x128xf32>
    tpu.vector_store %arg7[%c2, %c0_55, %c0_56], %73 {strides = array<i32>} : memref<8x8x128xf32, #tpu.memory_space<vmem>>, vector<1x8x128xf32>,
    %c5 = arith.constant 5 : index
    %c0_57 = arith.constant 0 : index
    %c0_58 = arith.constant 0 : index
    %74 = vector.load %arg8[%c5, %c0_57, %c0_58] : memref<8x8x128xf32, #tpu.memory_space<vmem>>, vector<1x8x128xf32>
    %75 = vector.shape_cast %74 : vector<1x8x128xf32> to vector<8x128xf32>
    %76 = vector.shape_cast %70 : vector<8x128xf32> to vector<1x8x128xf32>
    tpu.vector_store %arg8[%c5, %c0_57, %c0_58], %76 {strides = array<i32>} : memref<8x8x128xf32, #tpu.memory_space<vmem>>, vector<1x8x128xf32>,
    %c24 = arith.constant 24 : index
    %c0_59 = arith.constant 0 : index
    %77 = vector.load %arg11[%c24, %c0_59] : memref<64x128xf32, #tpu.memory_space<vmem>>, vector<8x128xf32>
    %78 = arith.truncf %65 : vector<8x128xf32> to vector<8x128xbf16>
    %cst_60 = arith.constant dense<0.000000e+00> : vector<8x128xf32>
    %79 = tpu.matmul %78, %8, %cst_60 {dimension_numbers = #tpu.dot_dimension_numbers<[1], [0], [0], [1], [0, 0, 1, 1], [], []>} : vector<8x128xbf16>, vector<128x128xbf16>, vector<8x128xf32> -> vector<8x128xf32>
    %80 = arith.addf %77, %79 : vector<8x128xf32>
    %81 = math.tanh %80 : vector<8x128xf32>
    %c32 = arith.constant 32 : index
    %c0_61 = arith.constant 0 : index
    %82 = vector.load %arg12[%c32, %c0_61] : memref<64x128xf32, #tpu.memory_space<vmem>>, vector<8x128xf32>
    %83 = arith.truncf %70 : vector<8x128xf32> to vector<8x128xbf16>
    %cst_62 = arith.constant dense<0.000000e+00> : vector<8x128xf32>
    %84 = tpu.matmul %83, %10, %cst_62 {dimension_numbers = #tpu.dot_dimension_numbers<[1], [0], [0], [1], [0, 0, 1, 1], [], []>} : vector<8x128xbf16>, vector<128x128xbf16>, vector<8x128xf32> -> vector<8x128xf32>
    %85 = arith.addf %82, %84 : vector<8x128xf32>
    %86 = math.tanh %85 : vector<8x128xf32>
    %c3 = arith.constant 3 : index
    %c0_63 = arith.constant 0 : index
    %c0_64 = arith.constant 0 : index
    %87 = vector.load %arg7[%c3, %c0_63, %c0_64] : memref<8x8x128xf32, #tpu.memory_space<vmem>>, vector<1x8x128xf32>
    %88 = vector.shape_cast %87 : vector<1x8x128xf32> to vector<8x128xf32>
    %89 = vector.shape_cast %81 : vector<8x128xf32> to vector<1x8x128xf32>
    tpu.vector_store %arg7[%c3, %c0_63, %c0_64], %89 {strides = array<i32>} : memref<8x8x128xf32, #tpu.memory_space<vmem>>, vector<1x8x128xf32>,
    %c4 = arith.constant 4 : index
    %c0_65 = arith.constant 0 : index
    %c0_66 = arith.constant 0 : index
    %90 = vector.load %arg8[%c4, %c0_65, %c0_66] : memref<8x8x128xf32, #tpu.memory_space<vmem>>, vector<1x8x128xf32>
    %91 = vector.shape_cast %90 : vector<1x8x128xf32> to vector<8x128xf32>
    %92 = vector.shape_cast %86 : vector<8x128xf32> to vector<1x8x128xf32>
    tpu.vector_store %arg8[%c4, %c0_65, %c0_66], %92 {strides = array<i32>} : memref<8x8x128xf32, #tpu.memory_space<vmem>>, vector<1x8x128xf32>,
    %c32_67 = arith.constant 32 : index
    %c0_68 = arith.constant 0 : index
    %93 = vector.load %arg11[%c32_67, %c0_68] : memref<64x128xf32, #tpu.memory_space<vmem>>, vector<8x128xf32>
    %94 = arith.truncf %81 : vector<8x128xf32> to vector<8x128xbf16>
    %cst_69 = arith.constant dense<0.000000e+00> : vector<8x128xf32>
    %95 = tpu.matmul %94, %8, %cst_69 {dimension_numbers = #tpu.dot_dimension_numbers<[1], [0], [0], [1], [0, 0, 1, 1], [], []>} : vector<8x128xbf16>, vector<128x128xbf16>, vector<8x128xf32> -> vector<8x128xf32>
    %96 = arith.addf %93, %95 : vector<8x128xf32>
    %97 = math.tanh %96 : vector<8x128xf32>
    %c24_70 = arith.constant 24 : index
    %c0_71 = arith.constant 0 : index
    %98 = vector.load %arg12[%c24_70, %c0_71] : memref<64x128xf32, #tpu.memory_space<vmem>>, vector<8x128xf32>
    %99 = arith.truncf %86 : vector<8x128xf32> to vector<8x128xbf16>
    %cst_72 = arith.constant dense<0.000000e+00> : vector<8x128xf32>
    %100 = tpu.matmul %99, %10, %cst_72 {dimension_numbers = #tpu.dot_dimension_numbers<[1], [0], [0], [1], [0, 0, 1, 1], [], []>} : vector<8x128xbf16>, vector<128x128xbf16>, vector<8x128xf32> -> vector<8x128xf32>
    %101 = arith.addf %98, %100 : vector<8x128xf32>
    %102 = math.tanh %101 : vector<8x128xf32>
    %c4_73 = arith.constant 4 : index
    %c0_74 = arith.constant 0 : index
    %c0_75 = arith.constant 0 : index
    %103 = vector.load %arg7[%c4_73, %c0_74, %c0_75] : memref<8x8x128xf32, #tpu.memory_space<vmem>>, vector<1x8x128xf32>
    %104 = vector.shape_cast %103 : vector<1x8x128xf32> to vector<8x128xf32>
    %105 = vector.shape_cast %97 : vector<8x128xf32> to vector<1x8x128xf32>
    tpu.vector_store %arg7[%c4_73, %c0_74, %c0_75], %105 {strides = array<i32>} : memref<8x8x128xf32, #tpu.memory_space<vmem>>, vector<1x8x128xf32>,
    %c3_76 = arith.constant 3 : index
    %c0_77 = arith.constant 0 : index
    %c0_78 = arith.constant 0 : index
    %106 = vector.load %arg8[%c3_76, %c0_77, %c0_78] : memref<8x8x128xf32, #tpu.memory_space<vmem>>, vector<1x8x128xf32>
    %107 = vector.shape_cast %106 : vector<1x8x128xf32> to vector<8x128xf32>
    %108 = vector.shape_cast %102 : vector<8x128xf32> to vector<1x8x128xf32>
    tpu.vector_store %arg8[%c3_76, %c0_77, %c0_78], %108 {strides = array<i32>} : memref<8x8x128xf32, #tpu.memory_space<vmem>>, vector<1x8x128xf32>,
    %c40_79 = arith.constant 40 : index
    %c0_80 = arith.constant 0 : index
    %109 = vector.load %arg11[%c40_79, %c0_80] : memref<64x128xf32, #tpu.memory_space<vmem>>, vector<8x128xf32>
    %110 = arith.truncf %97 : vector<8x128xf32> to vector<8x128xbf16>
    %cst_81 = arith.constant dense<0.000000e+00> : vector<8x128xf32>
    %111 = tpu.matmul %110, %8, %cst_81 {dimension_numbers = #tpu.dot_dimension_numbers<[1], [0], [0], [1], [0, 0, 1, 1], [], []>} : vector<8x128xbf16>, vector<128x128xbf16>, vector<8x128xf32> -> vector<8x128xf32>
    %112 = arith.addf %109, %111 : vector<8x128xf32>
    %113 = math.tanh %112 : vector<8x128xf32>
    %c16_82 = arith.constant 16 : index
    %c0_83 = arith.constant 0 : index
    %114 = vector.load %arg12[%c16_82, %c0_83] : memref<64x128xf32, #tpu.memory_space<vmem>>, vector<8x128xf32>
    %115 = arith.truncf %102 : vector<8x128xf32> to vector<8x128xbf16>
    %cst_84 = arith.constant dense<0.000000e+00> : vector<8x128xf32>
    %116 = tpu.matmul %115, %10, %cst_84 {dimension_numbers = #tpu.dot_dimension_numbers<[1], [0], [0], [1], [0, 0, 1, 1], [], []>} : vector<8x128xbf16>, vector<128x128xbf16>, vector<8x128xf32> -> vector<8x128xf32>
    %117 = arith.addf %114, %116 : vector<8x128xf32>
    %118 = math.tanh %117 : vector<8x128xf32>
    %c5_85 = arith.constant 5 : index
    %c0_86 = arith.constant 0 : index
    %c0_87 = arith.constant 0 : index
    %119 = vector.load %arg7[%c5_85, %c0_86, %c0_87] : memref<8x8x128xf32, #tpu.memory_space<vmem>>, vector<1x8x128xf32>
    %120 = vector.shape_cast %119 : vector<1x8x128xf32> to vector<8x128xf32>
    %121 = vector.shape_cast %113 : vector<8x128xf32> to vector<1x8x128xf32>
    tpu.vector_store %arg7[%c5_85, %c0_86, %c0_87], %121 {strides = array<i32>} : memref<8x8x128xf32, #tpu.memory_space<vmem>>, vector<1x8x128xf32>,
    %c2_88 = arith.constant 2 : index
    %c0_89 = arith.constant 0 : index
    %c0_90 = arith.constant 0 : index
    %122 = vector.load %arg8[%c2_88, %c0_89, %c0_90] : memref<8x8x128xf32, #tpu.memory_space<vmem>>, vector<1x8x128xf32>
    %123 = vector.shape_cast %122 : vector<1x8x128xf32> to vector<8x128xf32>
    %124 = vector.shape_cast %118 : vector<8x128xf32> to vector<1x8x128xf32>
    tpu.vector_store %arg8[%c2_88, %c0_89, %c0_90], %124 {strides = array<i32>} : memref<8x8x128xf32, #tpu.memory_space<vmem>>, vector<1x8x128xf32>,
    %c48_91 = arith.constant 48 : index
    %c0_92 = arith.constant 0 : index
    %125 = vector.load %arg11[%c48_91, %c0_92] : memref<64x128xf32, #tpu.memory_space<vmem>>, vector<8x128xf32>
    %126 = arith.truncf %113 : vector<8x128xf32> to vector<8x128xbf16>
    %cst_93 = arith.constant dense<0.000000e+00> : vector<8x128xf32>
    %127 = tpu.matmul %126, %8, %cst_93 {dimension_numbers = #tpu.dot_dimension_numbers<[1], [0], [0], [1], [0, 0, 1, 1], [], []>} : vector<8x128xbf16>, vector<128x128xbf16>, vector<8x128xf32> -> vector<8x128xf32>
    %128 = arith.addf %125, %127 : vector<8x128xf32>
    %129 = math.tanh %128 : vector<8x128xf32>
    %c8_94 = arith.constant 8 : index
    %c0_95 = arith.constant 0 : index
    %130 = vector.load %arg12[%c8_94, %c0_95] : memref<64x128xf32, #tpu.memory_space<vmem>>, vector<8x128xf32>
    %131 = arith.truncf %118 : vector<8x128xf32> to vector<8x128xbf16>
    %cst_96 = arith.constant dense<0.000000e+00> : vector<8x128xf32>
    %132 = tpu.matmul %131, %10, %cst_96 {dimension_numbers = #tpu.dot_dimension_numbers<[1], [0], [0], [1], [0, 0, 1, 1], [], []>} : vector<8x128xbf16>, vector<128x128xbf16>, vector<8x128xf32> -> vector<8x128xf32>
    %133 = arith.addf %130, %132 : vector<8x128xf32>
    %134 = math.tanh %133 : vector<8x128xf32>
    %c6_97 = arith.constant 6 : index
    %c0_98 = arith.constant 0 : index
    %c0_99 = arith.constant 0 : index
    %135 = vector.load %arg7[%c6_97, %c0_98, %c0_99] : memref<8x8x128xf32, #tpu.memory_space<vmem>>, vector<1x8x128xf32>
    %136 = vector.shape_cast %135 : vector<1x8x128xf32> to vector<8x128xf32>
    %137 = vector.shape_cast %129 : vector<8x128xf32> to vector<1x8x128xf32>
    tpu.vector_store %arg7[%c6_97, %c0_98, %c0_99], %137 {strides = array<i32>} : memref<8x8x128xf32, #tpu.memory_space<vmem>>, vector<1x8x128xf32>,
    %c1_100 = arith.constant 1 : index
    %c0_101 = arith.constant 0 : index
    %c0_102 = arith.constant 0 : index
    %138 = vector.load %arg8[%c1_100, %c0_101, %c0_102] : memref<8x8x128xf32, #tpu.memory_space<vmem>>, vector<1x8x128xf32>
    %139 = vector.shape_cast %138 : vector<1x8x128xf32> to vector<8x128xf32>
    %140 = vector.shape_cast %134 : vector<8x128xf32> to vector<1x8x128xf32>
    tpu.vector_store %arg8[%c1_100, %c0_101, %c0_102], %140 {strides = array<i32>} : memref<8x8x128xf32, #tpu.memory_space<vmem>>, vector<1x8x128xf32>,
    %c56_103 = arith.constant 56 : index
    %c0_104 = arith.constant 0 : index
    %141 = vector.load %arg11[%c56_103, %c0_104] : memref<64x128xf32, #tpu.memory_space<vmem>>, vector<8x128xf32>
    %142 = arith.truncf %129 : vector<8x128xf32> to vector<8x128xbf16>
    %cst_105 = arith.constant dense<0.000000e+00> : vector<8x128xf32>
    %143 = tpu.matmul %142, %8, %cst_105 {dimension_numbers = #tpu.dot_dimension_numbers<[1], [0], [0], [1], [0, 0, 1, 1], [], []>} : vector<8x128xbf16>, vector<128x128xbf16>, vector<8x128xf32> -> vector<8x128xf32>
    %144 = arith.addf %141, %143 : vector<8x128xf32>
    %145 = math.tanh %144 : vector<8x128xf32>
    %c0_106 = arith.constant 0 : index
    %c0_107 = arith.constant 0 : index
    %146 = vector.load %arg12[%c0_106, %c0_107] : memref<64x128xf32, #tpu.memory_space<vmem>>, vector<8x128xf32>
    %147 = arith.truncf %134 : vector<8x128xf32> to vector<8x128xbf16>
    %cst_108 = arith.constant dense<0.000000e+00> : vector<8x128xf32>
    %148 = tpu.matmul %147, %10, %cst_108 {dimension_numbers = #tpu.dot_dimension_numbers<[1], [0], [0], [1], [0, 0, 1, 1], [], []>} : vector<8x128xbf16>, vector<128x128xbf16>, vector<8x128xf32> -> vector<8x128xf32>
    %149 = arith.addf %146, %148 : vector<8x128xf32>
    %150 = math.tanh %149 : vector<8x128xf32>
    %c7_109 = arith.constant 7 : index
    %c0_110 = arith.constant 0 : index
    %c0_111 = arith.constant 0 : index
    %151 = vector.load %arg7[%c7_109, %c0_110, %c0_111] : memref<8x8x128xf32, #tpu.memory_space<vmem>>, vector<1x8x128xf32>
    %152 = vector.shape_cast %151 : vector<1x8x128xf32> to vector<8x128xf32>
    %153 = vector.shape_cast %145 : vector<8x128xf32> to vector<1x8x128xf32>
    tpu.vector_store %arg7[%c7_109, %c0_110, %c0_111], %153 {strides = array<i32>} : memref<8x8x128xf32, #tpu.memory_space<vmem>>, vector<1x8x128xf32>,
    %c0_112 = arith.constant 0 : index
    %c0_113 = arith.constant 0 : index
    %c0_114 = arith.constant 0 : index
    %154 = vector.load %arg8[%c0_112, %c0_113, %c0_114] : memref<8x8x128xf32, #tpu.memory_space<vmem>>, vector<1x8x128xf32>
    %155 = vector.shape_cast %154 : vector<1x8x128xf32> to vector<8x128xf32>
    %156 = vector.shape_cast %150 : vector<8x128xf32> to vector<1x8x128xf32>
    tpu.vector_store %arg8[%c0_112, %c0_113, %c0_114], %156 {strides = array<i32>} : memref<8x8x128xf32, #tpu.memory_space<vmem>>, vector<1x8x128xf32>,
    %c0_115 = arith.constant 0 : index
    %c0_116 = arith.constant 0 : index
    %157 = vector.load %arg9[%c0_115, %c0_116] : memref<8x128xf32, #tpu.memory_space<vmem>>, vector<8x128xf32>
    tpu.vector_store %arg9[%c0_115, %c0_116], %145 {strides = array<i32>} : memref<8x128xf32, #tpu.memory_space<vmem>>, vector<8x128xf32>,
    %c0_117 = arith.constant 0 : index
    %c0_118 = arith.constant 0 : index
    %158 = vector.load %arg10[%c0_117, %c0_118] : memref<8x128xf32, #tpu.memory_space<vmem>>, vector<8x128xf32>
    tpu.vector_store %arg10[%c0_117, %c0_118], %150 {strides = array<i32>} : memref<8x128xf32, #tpu.memory_space<vmem>>, vector<8x128xf32>,
    return
  }
  func.func @transform_0(%arg0: i32) -> (i32, i32, i32) {
    %c0_i32 = arith.constant 0 : i32
    %c0_i32_0 = arith.constant 0 : i32
    %c0_i32_1 = arith.constant 0 : i32
    return %arg0, %c0_i32, %c0_i32_0 : i32, i32, i32
  }
  func.func @transform_1(%arg0: i32) -> (i32, i32, i32) {
    %c0_i32 = arith.constant 0 : i32
    %0 = arith.subi %c0_i32, %arg0 : i32
    %c0_i32_0 = arith.constant 0 : i32
    %c0_i32_1 = arith.constant 0 : i32
    %c0_i32_2 = arith.constant 0 : i32
    return %0, %c0_i32_0, %c0_i32_1 : i32, i32, i32
  }
  func.func @transform_2(%arg0: i32) -> (i32, i32, i32) {
    %c0_i32 = arith.constant 0 : i32
    %c0_i32_0 = arith.constant 0 : i32
    %c0_i32_1 = arith.constant 0 : i32
    %c0_i32_2 = arith.constant 0 : i32
    return %c0_i32, %c0_i32_0, %c0_i32_1 : i32, i32, i32
  }
  func.func @transform_3(%arg0: i32) -> (i32, i32, i32) {
    %c0_i32 = arith.constant 0 : i32
    %c0_i32_0 = arith.constant 0 : i32
    %c0_i32_1 = arith.constant 0 : i32
    %c0_i32_2 = arith.constant 0 : i32
    return %c0_i32, %c0_i32_0, %c0_i32_1 : i32, i32, i32
  }
  func.func @transform_4(%arg0: i32) -> (i32, i32, i32) {
    %c0_i32 = arith.constant 0 : i32
    %c0_i32_0 = arith.constant 0 : i32
    %c0_i32_1 = arith.constant 0 : i32
    %c0_i32_2 = arith.constant 0 : i32
    return %c0_i32, %c0_i32_0, %c0_i32_1 : i32, i32, i32
  }
  func.func @transform_5(%arg0: i32) -> (i32, i32, i32) {
    %c0_i32 = arith.constant 0 : i32
    %c0_i32_0 = arith.constant 0 : i32
    %c0_i32_1 = arith.constant 0 : i32
    %c0_i32_2 = arith.constant 0 : i32
    return %c0_i32, %c0_i32_0, %c0_i32_1 : i32, i32, i32
  }
  func.func @transform_6(%arg0: i32) -> (i32, i32, i32) {
    %c0_i32 = arith.constant 0 : i32
    %c0_i32_0 = arith.constant 0 : i32
    %c0_i32_1 = arith.constant 0 : i32
    return %arg0, %c0_i32, %c0_i32_0 : i32, i32, i32
  }
  func.func @transform_7(%arg0: i32) -> (i32, i32, i32) {
    %c0_i32 = arith.constant 0 : i32
    %0 = arith.subi %c0_i32, %arg0 : i32
    %c0_i32_0 = arith.constant 0 : i32
    %c0_i32_1 = arith.constant 0 : i32
    %c0_i32_2 = arith.constant 0 : i32
    return %0, %c0_i32_0, %c0_i32_1 : i32, i32, i32
  }
}

</mosaic_0001>

<bundles_post_ra>
// kernel: tpu_custom_call.1
= control target key start
LH: loop header
LB: loop body
LE: loop exit
PB: predicated region body
PF: predicated region fallthrough
CT: control target
= control target key end

     0   :  { %13 = vsyncpa [#allocation7], 0  ;;  %s1304_s0 = inlined_call_operand.vmem [shape: bf16[1,64,16], index: 0, kind: input, shape index: {}]   ;;  %s1305_s1 = inlined_call_operand.vmem [shape: bf16[1,64,16], index: 1, kind: input, shape index: {}]   ;;  %s1306_s2 = inlined_call_operand.vmem [shape: bf16[2,16,128], index: 2, kind: input, shape index: {}]   ;;  %s1307_s3 = inlined_call_operand.hbm [shape: bf16[2,128,128], index: 3, kind: input, shape index: {}]   ;;  %s1308_s4 = inlined_call_operand.vmem [shape: f32[2,1,128], index: 4, kind: input, shape index: {}]   ;;  %s1309_s5 = inlined_call_operand.vmem [shape: f32[2,8,128], index: 5, kind: input, shape index: {}]   ;;  %s1310_s6 = inlined_call_operand.hbm [shape: f32[8,8,128], index: 6, kind: output, shape index: {0}]   ;;  %s1311_s7 = inlined_call_operand.hbm [shape: f32[8,8,128], index: 7, kind: output, shape index: {1}]  }
   0x1   :  { %14 = vsyncpa [#allocation8], 0 }
   0x2   :  { %15 = vsyncpa [#allocation11], 0  ;;  %s33_s26 = sshll.u32 %s1307_s3, 4  ;;  %s1001_s27 = smov [#allocation6]   ;;  %s34_s26 = int_to_ptr.hbm [resolvable:$true] %s33_s26 }
   0x3   :  { %s35_s28 = sshll.u32 %s1001_s27, 4  ;;  %s1002_s29 = smov 64   ;;  %s36_s28 = int_to_ptr.vmem [resolvable:$true] %s35_s28 }
   0x4   :  { %s1003_s30 = smov 4  }
   0x5   :  { %41 = dma.hbm_to_vmem [thread:$0]  %s34_s26, 2048, %s36_s28, [#allocation7], %s1002_s29, %s1002_s29, %s1003_s30  }
   0x6   :  { %995 = dma.done.wait [#allocation7], 2048  }
   0x7   :  { %996 = vsyncadd [#allocation7], 4294965248  ;;  %v857_v0 = vld [vmem:[%s1306_s2 + $0x8] sm:$0xff]  ;;  %v1054_v1 = vld [vmem:[#allocation6 + $0x38] sm:$0xff]  ;;  %vm153_vm0 = vcmask 130048   ;;  %s697_s11 = sshll.u32 %s1310_s6, 4  ;;  %s698_s11 = int_to_ptr.hbm [resolvable:$true] %s697_s11 }
   0x8   :  { %v878_v2 = vld [vmem:[%s1305_s1] sm:$0xff]  ;;  %259 = vmatpush.bf16.msra.mxu1 %v857_v0  ;;  %341 = vmatpush.bf16.msra.mxu2 %v1054_v1  ;;  %v1060_v3 = vld [vmem:[#allocation6 + $0x30] sm:$0xff]  ;;  %v1062_v4 = vld [vmem:[#allocation6 + $0x78] sm:$0xff]  ;;  %s1005_s3 = smov 128   ;;  %s1006_s12 = smov 8  }
   0x9   :  { %406 = vmatpush.bf16.msra.mxu3 %v1062_v4  ;;  %v1065_v5 = vld [vmem:[#allocation6 + $0x70] sm:$0xff]  ;;  %v856_v6 = vld [vmem:[%s1306_s2] sm:$0xff]  ;;  %v1073_v7 = vld [vmem:[#allocation6 + $0x28] sm:$0xff]  ;;  %s1007_s13 = smov [#allocation10]   ;;  %s714_s16 = sshll.u32 %s1311_s7, 4  ;;  %s715_s16 = int_to_ptr.hbm [resolvable:$true] %s714_s16 }
   0xa   :  { %v874_v8 = vld [vmem:[%s1304_s0] sm:$0xff]  ;;  %173 = vmatpush.bf16.msra.mxu0 %v856_v6  ;;  %v1079_v9 = vld [vmem:[#allocation6 + $0x68] sm:$0xff]  ;;  %v1093_v12 = vld [vmem:[#allocation6 + $0x18] sm:$0xff]  ;;  %s712_s14 = sshll.u32 %s1007_s13, 4  ;;  %s713_s14 = int_to_ptr.vmem [resolvable:$true] %s712_s14 }
   0xb   :  { %788 = vmatmul.msk.bf16.vlgmr.msra.gmra.mxu1 %vm153_vm0, %v878_v2  ;;  %v1084_v10 = vld [vmem:[#allocation6 + $0x20] sm:$0xff]  ;;  %v1096_v13 = vld [vmem:[#allocation6 + $0x58] sm:$0xff]  ;;  %v879_v14 = vld [vmem:[%s1305_s1 + $0x8] sm:$0xff] }
   0xc   :  { %481 = vmatpush.bf16.msrb.mxu1 %v1062_v4  ;;  %342 = vmatpush.bf16.msra.mxu2 %v1060_v3  ;;  %v1088_v11 = vld [vmem:[#allocation6 + $0x60] sm:$0xff]  ;;  %v1104_v15 = vld [vmem:[#allocation6 + $0x10] sm:$0xff]  ;;  %v1112_v17 = vld [vmem:[#allocation6 + $0x8] sm:$0xff] }
   0xd   :  { %407 = vmatpush.bf16.msra.mxu3 %v1065_v5  ;;  %764 = vmatmul.msk.bf16.vlgmr.msra.gmra.mxu0 %vm153_vm0, %v874_v8  ;;  %v1107_v16 = vld [vmem:[#allocation6 + $0x50] sm:$0xff]  ;;  %v1116_v18 = vld [vmem:[#allocation6 + $0x48] sm:$0xff]  ;;  %v1120_v19 = vld [vmem:[#allocation6] sm:$0xff] }
   0xe   :  { %464 = vmatpush.bf16.msrb.mxu0 %v1054_v1  ;;  %v70_v20 = vld [vmem:[%s1309_s5] sm:$0xff]  ;;  %v740_v22 = vld [vmem:[%s1309_s5 + $0x8] sm:$0xff]  ;;  %v880_v25 = vld [vmem:[%s1305_s1 + $0x10] sm:$0xff] }
   0xf   :  { %v1127_v21 = vld [vmem:[#allocation6 + $0x40] sm:$0xff]  ;;  %v292_v23 = vpack.c.bf16 %v70_v20, %v70_v20  ;;  %v357_v24 = vpack.c.bf16 %v740_v22, %v740_v22  ;;  %v881_v26 = vld [vmem:[%s1305_s1 + $0x18] sm:$0xff]  ;;  %v875_v44 = vld [vmem:[%s1304_s0 + $0x8] sm:$0xff] }
  0x10   :  { %482 = vmatpush.bf16.msrb.mxu1 %v1065_v5  ;;  %343 = vmatpush.bf16.msra.mxu2 %v1073_v7  ;;  %v889_v27 = vld [vmem:[%s1308_s4 + $0x1] ss:$0 sm:$0xff]  ;;  %v1209_v36 = vld [vmem:[%s1308_s4] ss:$0 sm:$0xff]  ;;  %v876_v53 = vld [vmem:[%s1304_s0 + $0x10] sm:$0xff] }
  0x11   :  { %408 = vmatpush.bf16.msra.mxu3 %v1079_v9  ;;  %v877_v59 = vld [vmem:[%s1304_s0 + $0x18] sm:$0xff]  ;;  %s1004_s0 = smov [#allocation9]  }
  0x12   :  { %465 = vmatpush.bf16.msrb.mxu0 %v1060_v3  ;;  %s695_s8 = sshll.u32 %s1004_s0, 4  ;;  %s696_s8 = int_to_ptr.vmem [resolvable:$true] %s695_s8 }
  0x14   :  { %483 = vmatpush.bf16.msrb.mxu1 %v1079_v9  ;;  %344 = vmatpush.bf16.msra.mxu2 %v1084_v10 }
  0x15   :  { %409 = vmatpush.bf16.msra.mxu3 %v1088_v11 }
  0x16   :  { %466 = vmatpush.bf16.msrb.mxu0 %v1073_v7 }
  0x18   :  { %484 = vmatpush.bf16.msrb.mxu1 %v1088_v11  ;;  %345 = vmatpush.bf16.msra.mxu2 %v1093_v12 }
  0x19   :  { %410 = vmatpush.bf16.msra.mxu3 %v1096_v13 }
  0x1a   :  { %467 = vmatpush.bf16.msrb.mxu0 %v1084_v10 }
  0x1b   :  { %789 = vmatmul.msk.bf16.gmra.mxu1 %vm153_vm0, %v879_v14 }
  0x1c   :  { %346 = vmatpush.bf16.msra.mxu2 %v1104_v15  ;;  %485 = vmatpush.bf16.msrb.mxu1 %v1096_v13 }
  0x1d   :  { %411 = vmatpush.bf16.msra.mxu3 %v1107_v16  ;;  %765 = vmatmul.msk.bf16.gmra.mxu0 %vm153_vm0, %v875_v44 }
  0x1e   :  { %468 = vmatpush.bf16.msrb.mxu0 %v1093_v12 }
  0x20   :  { %347 = vmatpush.bf16.msra.mxu2 %v1112_v17  ;;  %486 = vmatpush.bf16.msrb.mxu1 %v1107_v16 }
  0x21   :  { %412 = vmatpush.bf16.msra.mxu3 %v1116_v18 }
  0x22   :  { %469 = vmatpush.bf16.msrb.mxu0 %v1104_v15 }
  0x24   :  { %348 = vmatpush.bf16.msra.mxu2 %v1120_v19  ;;  %487 = vmatpush.bf16.msrb.mxu1 %v1116_v18 }
  0x25   :  { %413 = vmatpush.bf16.msra.mxu3 %v1127_v21 }
  0x26   :  { %470 = vmatpush.bf16.msrb.mxu0 %v1112_v17 }
  0x27   :  { %349 = vmatmul.bf16.vlgmr.msra.gmra.mxu2 %v292_v23 }
  0x28   :  { %426 = vmatpush.bf16.msrb.mxu2 %v1054_v1  ;;  %488 = vmatpush.bf16.msrb.mxu1 %v1127_v21 }
  0x29   :  { %443 = vmatpush.bf16.msrb.mxu3 %v1062_v4 }
  0x2a   :  { %414 = vmatmul.bf16.vlgmr.msra.gmra.mxu3 %v357_v24  ;;  %471 = vmatpush.bf16.msrb.mxu0 %v1120_v19 }
  0x2b   :  { %790 = vmatmul.msk.bf16.gmra.mxu1 %vm153_vm0, %v880_v25 }
  0x2c   :  { %427 = vmatpush.bf16.msrb.mxu2 %v1060_v3  ;;  %557 = vmatpush.bf16.msra.mxu1 %v1062_v4 }
  0x2d   :  { %444 = vmatpush.bf16.msrb.mxu3 %v1065_v5  ;;  %766 = vmatmul.msk.bf16.gmra.mxu0 %vm153_vm0, %v876_v53 }
  0x2e   :  { %540 = vmatpush.bf16.msra.mxu0 %v1054_v1 }
  0x30   :  { %428 = vmatpush.bf16.msrb.mxu2 %v1073_v7  ;;  %558 = vmatpush.bf16.msra.mxu1 %v1065_v5 }
  0x31   :  { %445 = vmatpush.bf16.msrb.mxu3 %v1079_v9 }
  0x32   :  { %541 = vmatpush.bf16.msra.mxu0 %v1060_v3 }
  0x34   :  { %429 = vmatpush.bf16.msrb.mxu2 %v1084_v10  ;;  %559 = vmatpush.bf16.msra.mxu1 %v1079_v9 }
  0x35   :  { %446 = vmatpush.bf16.msrb.mxu3 %v1088_v11 }
  0x36   :  { %542 = vmatpush.bf16.msra.mxu0 %v1073_v7 }
  0x38   :  { %430 = vmatpush.bf16.msrb.mxu2 %v1093_v12  ;;  %560 = vmatpush.bf16.msra.mxu1 %v1088_v11 }
  0x39   :  { %447 = vmatpush.bf16.msrb.mxu3 %v1096_v13 }
  0x3a   :  { %543 = vmatpush.bf16.msra.mxu0 %v1084_v10 }
  0x3b   :  { %791 = vmatmul.msk.bf16.gmra.mxu1 %vm153_vm0, %v881_v26 }
  0x3c   :  { %431 = vmatpush.bf16.msrb.mxu2 %v1104_v15  ;;  %561 = vmatpush.bf16.msra.mxu1 %v1096_v13 }
  0x3d   :  { %448 = vmatpush.bf16.msrb.mxu3 %v1107_v16  ;;  %767 = vmatmul.msk.bf16.gmra.mxu0 %vm153_vm0, %v877_v59 }
  0x3e   :  { %544 = vmatpush.bf16.msra.mxu0 %v1093_v12 }
  0x40   :  { %432 = vmatpush.bf16.msrb.mxu2 %v1112_v17  ;;  %562 = vmatpush.bf16.msra.mxu1 %v1107_v16 }
  0x41   :  { %449 = vmatpush.bf16.msrb.mxu3 %v1116_v18 }
  0x42   :  { %545 = vmatpush.bf16.msra.mxu0 %v1104_v15 }
  0x44   :  { %433 = vmatpush.bf16.msrb.mxu2 %v1120_v19  ;;  %563 = vmatpush.bf16.msra.mxu1 %v1116_v18 }
  0x45   :  { %450 = vmatpush.bf16.msrb.mxu3 %v1127_v21 }
  0x46   :  { %546 = vmatpush.bf16.msra.mxu0 %v1112_v17 }
  0x48   :  { %502 = vmatpush.bf16.msra.mxu2 %v1054_v1  ;;  %564 = vmatpush.bf16.msra.mxu1 %v1127_v21 }
  0x49   :  { %519 = vmatpush.bf16.msra.mxu3 %v1062_v4 }
  0x4a   :  { %547 = vmatpush.bf16.msra.mxu0 %v1120_v19 }
  0x4c   :  { %503 = vmatpush.bf16.msra.mxu2 %v1060_v3 }
  0x4d   :  { %520 = vmatpush.bf16.msra.mxu3 %v1065_v5 }
  0x50   :  { %504 = vmatpush.bf16.msra.mxu2 %v1073_v7 }
  0x51   :  { %521 = vmatpush.bf16.msra.mxu3 %v1079_v9 }
  0x54   :  { %505 = vmatpush.bf16.msra.mxu2 %v1084_v10 }
  0x55   :  { %522 = vmatpush.bf16.msra.mxu3 %v1088_v11 }
  0x58   :  { %506 = vmatpush.bf16.msra.mxu2 %v1093_v12 }
  0x59   :  { %523 = vmatpush.bf16.msra.mxu3 %v1096_v13 }
  0x5c   :  { %507 = vmatpush.bf16.msra.mxu2 %v1104_v15 }
  0x5d   :  { %524 = vmatpush.bf16.msra.mxu3 %v1107_v16 }
  0x60   :  { %508 = vmatpush.bf16.msra.mxu2 %v1112_v17 }
  0x61   :  { %525 = vmatpush.bf16.msra.mxu3 %v1116_v18 }
  0x64   :  { %509 = vmatpush.bf16.msra.mxu2 %v1120_v19 }
  0x65   :  { %526 = vmatpush.bf16.msra.mxu3 %v1127_v21 }
  0x88   :  { %v261_v28 = vpop.f32.mrf.mxu1 }
  0x89   :  { %v1198_v29 = vadd.f32 %v889_v27, %v261_v28 }
  0x8a   :  { %v175_v37 = vpop.f32.mrf.mxu0 }
  0x8b   :  { %v176_v38 = vadd.f32 %v1209_v36, %v175_v37 }
  0x90   :  { %v263_v30 = vpop.f32.mrf.mxu1 }
  0x91   :  { %v1200_v31 = vadd.f32 %v889_v27, %v263_v30 }
  0x92   :  { %v177_v60 = vpop.f32.mrf.mxu0 }
  0x93   :  { %v178_v61 = vadd.f32 %v1209_v36, %v177_v60 }
  0x98   :  { %v266_v32 = vpop.f32.mrf.mxu1 }
  0x99   :  { %v1202_v33 = vadd.f32 %v889_v27, %v266_v32 }
  0x9a   :  { %v180_v24 = vpop.f32.mrf.mxu0 }
  0x9b   :  { %v181_v32 = vadd.f32 %v1209_v36, %v180_v24 }
  0xa0   :  { %v268_v34 = vpop.f32.mrf.mxu1 }
  0xa1   :  { %v1204_v35 = vadd.f32 %v889_v27, %v268_v34 }
  0xa2   :  { %v182_v25 = vpop.f32.mrf.mxu0 }
  0xa8   :  { %v271_v39 = vpop.f32.mrf.mxu1 }
  0xa9   :  { %v1212_v40 = vadd.f32 %v889_v27, %v271_v39 }
  0xaa   :  { %v350_v41 = vpop.f32.mrf.mxu2  ;;  %v185_v26 = vpop.f32.mrf.mxu0 }
  0xab   :  { %v354_v42 = vadd.f32 %v350_v41, %v176_v38 }
  0xad   :  { %v415_v43 = vpop.f32.mrf.mxu3  ;;  %891 = vtanh.f32 %v354_v42 }
  0xb0   :  { %v273_v45 = vpop.f32.mrf.mxu1 }
  0xb1   :  { %v1218_v46 = vadd.f32 %v889_v27, %v273_v45 }
  0xb2   :  { %v352_v47 = vpop.f32.mrf.mxu2 }
  0xb3   :  { %v892_v48 = vpop.eup %891 }
  0xb4   :  { %421 = vst [vmem:[#allocation9] sm:$0xff] %v892_v48  ;;  %v425_v49 = vpack.c.bf16 %v892_v48, %v892_v48 }
  0xb5   :  { %v417_v50 = vpop.f32.mrf.mxu3 }
  0xb6   :  { %434 = vmatmul.bf16.vlgmr.msrb.gmra.mxu2 %v425_v49 }
  0xb7   :  { %578 = vmatpush.bf16.msrb.mxu2 %v1054_v1 }
  0xb8   :  { %v276_v51 = vpop.f32.mrf.mxu1 }
  0xb9   :  { %v277_v52 = vadd.f32 %v889_v27, %v276_v51 }
  0xbb   :  { %579 = vmatpush.bf16.msrb.mxu2 %v1060_v3 }
  0xbf   :  { %580 = vmatpush.bf16.msrb.mxu2 %v1073_v7 }
  0xc0   :  { %v278_v54 = vpop.f32.mrf.mxu1 }
  0xc1   :  { %v279_v55 = vadd.f32 %v889_v27, %v278_v54  ;;  %v1261_v27 = vpop.f32.mrf.mxu0 }
  0xc3   :  { %v419_v56 = vadd.f32 %v415_v43, %v279_v55  ;;  %581 = vmatpush.bf16.msrb.mxu2 %v1084_v10 }
  0xc5   :  { %893 = vtanh.f32 %v419_v56 }
  0xc7   :  { %582 = vmatpush.bf16.msrb.mxu2 %v1093_v12 }
  0xc9   :  { %v1263_v28 = vpop.f32.mrf.mxu0 }
  0xcb   :  { %v894_v57 = vpop.eup %893  ;;  %583 = vmatpush.bf16.msrb.mxu2 %v1104_v15 }
  0xcc   :  { %423 = vst [vmem:[#allocation10 + $0x38] sm:$0xff] %v894_v57  ;;  %v442_v58 = vpack.c.bf16 %v894_v57, %v894_v57 }
  0xce   :  { %451 = vmatmul.bf16.vlgmr.msrb.gmra.mxu3 %v442_v58 }
  0xcf   :  { %584 = vmatpush.bf16.msrb.mxu2 %v1112_v17  ;;  %595 = vmatpush.bf16.msrb.mxu3 %v1062_v4 }
  0xd1   :  { %v1265_v30 = vpop.f32.mrf.mxu0 }
  0xd2   :  { %v193_v24 = vadd.f32 %v1209_v36, %v1265_v30 }
  0xd3   :  { %585 = vmatpush.bf16.msrb.mxu2 %v1120_v19  ;;  %596 = vmatpush.bf16.msrb.mxu3 %v1065_v5 }
  0xd7   :  { %597 = vmatpush.bf16.msrb.mxu3 %v1079_v9 }
  0xdb   :  { %598 = vmatpush.bf16.msrb.mxu3 %v1088_v11 }
  0xdf   :  { %599 = vmatpush.bf16.msrb.mxu3 %v1096_v13 }
  0xe3   :  { %600 = vmatpush.bf16.msrb.mxu3 %v1107_v16 }
  0xe7   :  { %601 = vmatpush.bf16.msrb.mxu3 %v1116_v18 }
  0xeb   :  { %602 = vmatpush.bf16.msrb.mxu3 %v1127_v21 }
 0x139   :  { %v435_v62 = vpop.f32.mrf.mxu2 }
 0x13a   :  { %v439_v63 = vadd.f32 %v435_v62, %v178_v61  ;;  %v191_v62 = vadd.f32 %v1209_v36, %v1263_v28 }
 0x13c   :  { %895 = vtanh.f32 %v439_v63 }
 0x141   :  { %v437_v0 = vpop.f32.mrf.mxu2 }
 0x142   :  { %v896_v2 = vpop.eup %895 }
 0x143   :  { %459 = vst [vmem:[#allocation9 + $0x8] sm:$0xff] %v896_v2  ;;  %v463_v6 = vpack.c.bf16 %v896_v2, %v896_v2 }
 0x145   :  { %472 = vmatmul.bf16.vlgmr.msrb.gmra.mxu0 %v463_v6 }
 0x146   :  { %616 = vmatpush.bf16.msrb.mxu0 %v1054_v1 }
 0x14a   :  { %617 = vmatpush.bf16.msrb.mxu0 %v1060_v3 }
 0x14e   :  { %618 = vmatpush.bf16.msrb.mxu0 %v1073_v7 }
 0x151   :  { %v452_v8 = vpop.f32.mrf.mxu3 }
 0x152   :  { %v456_v14 = vadd.f32 %v452_v8, %v277_v52  ;;  %619 = vmatpush.bf16.msrb.mxu0 %v1084_v10  ;;  %v188_v52 = vadd.f32 %v1209_v36, %v1261_v27 }
 0x154   :  { %897 = vtanh.f32 %v456_v14 }
 0x156   :  { %620 = vmatpush.bf16.msrb.mxu0 %v1093_v12 }
 0x159   :  { %v454_v20 = vpop.f32.mrf.mxu3 }
 0x15a   :  { %v898_v22 = vpop.eup %897  ;;  %621 = vmatpush.bf16.msrb.mxu0 %v1104_v15 }
 0x15b   :  { %461 = vst [vmem:[#allocation10 + $0x30] sm:$0xff] %v898_v22  ;;  %v480_v23 = vpack.c.bf16 %v898_v22, %v898_v22 }
 0x15d   :  { %489 = vmatmul.bf16.vlgmr.msrb.gmra.mxu1 %v480_v23 }
 0x15e   :  { %622 = vmatpush.bf16.msrb.mxu0 %v1112_v17  ;;  %633 = vmatpush.bf16.msrb.mxu1 %v1062_v4 }
 0x162   :  { %623 = vmatpush.bf16.msrb.mxu0 %v1120_v19  ;;  %634 = vmatpush.bf16.msrb.mxu1 %v1065_v5 }
 0x166   :  { %635 = vmatpush.bf16.msrb.mxu1 %v1079_v9 }
 0x16a   :  { %636 = vmatpush.bf16.msrb.mxu1 %v1088_v11 }
 0x16e   :  { %637 = vmatpush.bf16.msrb.mxu1 %v1096_v13 }
 0x172   :  { %638 = vmatpush.bf16.msrb.mxu1 %v1107_v16 }
 0x176   :  { %639 = vmatpush.bf16.msrb.mxu1 %v1116_v18 }
 0x17a   :  { %640 = vmatpush.bf16.msrb.mxu1 %v1127_v21 }
 0x1c2   :  { %v473_v34 = vpop.f32.mrf.mxu0 }
 0x1c3   :  { %v477_v37 = vadd.f32 %v473_v34, %v181_v32 }
 0x1c5   :  { %899 = vtanh.f32 %v477_v37 }
 0x1ca   :  { %v475_v38 = vpop.f32.mrf.mxu0 }
 0x1cb   :  { %v900_v39 = vpop.eup %899 }
 0x1cc   :  { %497 = vst [vmem:[#allocation9 + $0x10] sm:$0xff] %v900_v39  ;;  %v501_v41 = vpack.c.bf16 %v900_v39, %v900_v39 }
 0x1ce   :  { %510 = vmatmul.bf16.vlgmr.msra.gmra.mxu2 %v501_v41 }
 0x1cf   :  { %654 = vmatpush.bf16.msra.mxu2 %v1054_v1  ;;  %v183_v1 = vadd.f32 %v1209_v36, %v182_v25 }
 0x1d3   :  { %655 = vmatpush.bf16.msra.mxu2 %v1060_v3 }
 0x1d7   :  { %656 = vmatpush.bf16.msra.mxu2 %v1073_v7 }
 0x1da   :  { %v490_v42 = vpop.f32.mrf.mxu1 }
 0x1db   :  { %v494_v43 = vadd.f32 %v490_v42, %v1218_v46  ;;  %657 = vmatpush.bf16.msra.mxu2 %v1084_v10 }
 0x1dd   :  { %901 = vtanh.f32 %v494_v43 }
 0x1df   :  { %658 = vmatpush.bf16.msra.mxu2 %v1093_v12 }
 0x1e2   :  { %v492_v44 = vpop.f32.mrf.mxu1 }
 0x1e3   :  { %v902_v45 = vpop.eup %901  ;;  %659 = vmatpush.bf16.msra.mxu2 %v1104_v15 }
 0x1e4   :  { %499 = vst [vmem:[#allocation10 + $0x28] sm:$0xff] %v902_v45  ;;  %v518_v47 = vpack.c.bf16 %v902_v45, %v902_v45 }
 0x1e6   :  { %527 = vmatmul.bf16.vlgmr.msra.gmra.mxu3 %v518_v47 }
 0x1e7   :  { %660 = vmatpush.bf16.msra.mxu2 %v1112_v17  ;;  %671 = vmatpush.bf16.msra.mxu3 %v1062_v4 }
 0x1eb   :  { %661 = vmatpush.bf16.msra.mxu2 %v1120_v19  ;;  %672 = vmatpush.bf16.msra.mxu3 %v1065_v5 }
 0x1ef   :  { %673 = vmatpush.bf16.msra.mxu3 %v1079_v9 }
 0x1f3   :  { %674 = vmatpush.bf16.msra.mxu3 %v1088_v11 }
 0x1f7   :  { %675 = vmatpush.bf16.msra.mxu3 %v1096_v13 }
 0x1fb   :  { %676 = vmatpush.bf16.msra.mxu3 %v1107_v16  ;;  %v186_v16 = vadd.f32 %v1209_v36, %v185_v26 }
 0x1ff   :  { %677 = vmatpush.bf16.msra.mxu3 %v1116_v18 }
 0x203   :  { %678 = vmatpush.bf16.msra.mxu3 %v1127_v21 }
 0x251   :  { %v511_v3 = vpop.f32.mrf.mxu2 }
 0x252   :  { %v515_v4 = vadd.f32 %v511_v3, %v183_v1 }
 0x254   :  { %903 = vtanh.f32 %v515_v4 }
 0x259   :  { %v513_v7 = vpop.f32.mrf.mxu2 }
 0x25a   :  { %v904_v10 = vpop.eup %903 }
 0x25b   :  { %535 = vst [vmem:[#allocation9 + $0x18] sm:$0xff] %v904_v10  ;;  %v539_v5 = vpack.c.bf16 %v904_v10, %v904_v10 }
 0x25d   :  { %548 = vmatmul.bf16.vlgmr.msra.gmra.mxu0 %v539_v5 }
 0x269   :  { %v528_v9 = vpop.f32.mrf.mxu3 }
 0x26a   :  { %v532_v11 = vadd.f32 %v528_v9, %v1212_v40 }
 0x26c   :  { %905 = vtanh.f32 %v532_v11 }
 0x271   :  { %v530_v12 = vpop.f32.mrf.mxu3 }
 0x272   :  { %v906_v13 = vpop.eup %905 }
 0x273   :  { %537 = vst [vmem:[#allocation10 + $0x20] sm:$0xff] %v906_v13  ;;  %v556_v15 = vpack.c.bf16 %v906_v13, %v906_v13 }
 0x275   :  { %565 = vmatmul.bf16.vlgmr.msra.gmra.mxu1 %v556_v15 }
 0x2da   :  { %v549_v17 = vpop.f32.mrf.mxu0 }
 0x2db   :  { %v553_v18 = vadd.f32 %v549_v17, %v186_v16 }
 0x2dd   :  { %907 = vtanh.f32 %v553_v18 }
 0x2e2   :  { %v551_v19 = vpop.f32.mrf.mxu0 }
 0x2e3   :  { %v908_v21 = vpop.eup %907 }
 0x2e4   :  { %573 = vst [vmem:[#allocation9 + $0x20] sm:$0xff] %v908_v21  ;;  %v577_v46 = vpack.c.bf16 %v908_v21, %v908_v21 }
 0x2e6   :  { %586 = vmatmul.bf16.vlgmr.msrb.gmra.mxu2 %v577_v46 }
 0x2f2   :  { %v566_v48 = vpop.f32.mrf.mxu1 }
 0x2f3   :  { %v570_v49 = vadd.f32 %v566_v48, %v1204_v35 }
 0x2f5   :  { %909 = vtanh.f32 %v570_v49 }
 0x2fa   :  { %v568_v40 = vpop.f32.mrf.mxu1 }
 0x2fb   :  { %v910_v50 = vpop.eup %909 }
 0x2fc   :  { %575 = vst [vmem:[#allocation10 + $0x18] sm:$0xff] %v910_v50  ;;  %v594_v51 = vpack.c.bf16 %v910_v50, %v910_v50 }
 0x2fe   :  { %603 = vmatmul.bf16.vlgmr.msrb.gmra.mxu3 %v594_v51 }
 0x369   :  { %v587_v53 = vpop.f32.mrf.mxu2 }
 0x36a   :  { %v591_v54 = vadd.f32 %v587_v53, %v188_v52 }
 0x36c   :  { %911 = vtanh.f32 %v591_v54 }
 0x371   :  { %v589_v55 = vpop.f32.mrf.mxu2 }
 0x372   :  { %v912_v56 = vpop.eup %911 }
 0x373   :  { %611 = vst [vmem:[#allocation9 + $0x28] sm:$0xff] %v912_v56  ;;  %v615_v57 = vpack.c.bf16 %v912_v56, %v912_v56 }
 0x375   :  { %624 = vmatmul.bf16.vlgmr.msrb.gmra.mxu0 %v615_v57 }
 0x381   :  { %v604_v58 = vpop.f32.mrf.mxu3 }
 0x382   :  { %v608_v35 = vadd.f32 %v604_v58, %v1202_v33 }
 0x384   :  { %913 = vtanh.f32 %v608_v35 }
 0x389   :  { %v606_v59 = vpop.f32.mrf.mxu3 }
 0x38a   :  { %v914_v60 = vpop.eup %913 }
 0x38b   :  { %613 = vst [vmem:[#allocation10 + $0x10] sm:$0xff] %v914_v60  ;;  %v632_v61 = vpack.c.bf16 %v914_v60, %v914_v60 }
 0x38d   :  { %641 = vmatmul.bf16.vlgmr.msrb.gmra.mxu1 %v632_v61 }
 0x3f2   :  { %v625_v63 = vpop.f32.mrf.mxu0 }
 0x3f3   :  { %v629_v0 = vadd.f32 %v625_v63, %v191_v62 }
 0x3f5   :  { %915 = vtanh.f32 %v629_v0 }
 0x3fa   :  { %v627_v2 = vpop.f32.mrf.mxu0 }
 0x3fb   :  { %v916_v6 = vpop.eup %915 }
 0x3fc   :  { %649 = vst [vmem:[#allocation9 + $0x30] sm:$0xff] %v916_v6  ;;  %v653_v8 = vpack.c.bf16 %v916_v6, %v916_v6 }
 0x3fe   :  { %662 = vmatmul.bf16.vlgmr.msra.gmra.mxu2 %v653_v8 }
 0x40a   :  { %v642_v14 = vpop.f32.mrf.mxu1 }
 0x40b   :  { %v646_v33 = vadd.f32 %v642_v14, %v1200_v31 }
 0x40d   :  { %917 = vtanh.f32 %v646_v33 }
 0x412   :  { %v644_v20 = vpop.f32.mrf.mxu1 }
 0x413   :  { %v918_v22 = vpop.eup %917 }
 0x414   :  { %651 = vst [vmem:[#allocation10 + $0x8] sm:$0xff] %v918_v22  ;;  %v670_v23 = vpack.c.bf16 %v918_v22, %v918_v22 }
 0x416   :  { %679 = vmatmul.bf16.vlgmr.msra.gmra.mxu3 %v670_v23 }
 0x481   :  { %v663_v25 = vpop.f32.mrf.mxu2 }
 0x482   :  { %v667_v26 = vadd.f32 %v663_v25, %v193_v24 }
 0x484   :  { %919 = vtanh.f32 %v667_v26 }
 0x489   :  { %v665_v31 = vpop.f32.mrf.mxu2 }
 0x48a   :  { %v920_v27 = vpop.eup %919 }
 0x48b   :  { %687 = vst [vmem:[#allocation9 + $0x38] sm:$0xff] %v920_v27 }
 0x48c   :  { %703 = dma.vmem_to_hbm [thread:$0]  %s696_s8, 1024, %s698_s11, [#allocation8], %s1005_s3, %s1005_s3, %s1006_s12  }
 0x499   :  { %v680_v28 = vpop.f32.mrf.mxu3 }
 0x49a   :  { %v684_v36 = vadd.f32 %v680_v28, %v1198_v29 }
 0x49c   :  { %921 = vtanh.f32 %v684_v36 }
 0x4a1   :  { %v682_v30 = vpop.f32.mrf.mxu3 }
 0x4a2   :  { %v922_v32 = vpop.eup %921 }
 0x4a3   :  { %688 = vst [vmem:[#allocation10] sm:$0xff] %v922_v32 }
 0x4a4   :  { %720 = dma.vmem_to_hbm [thread:$0]  %s713_s14, 1024, %s715_s16, [#allocation11], %s1005_s3, %s1005_s3, %s1006_s12  }
 0x4a5   :  { %997 = dma.done.wait [#allocation8], 1024  }
 0x4a6   :  { %998 = vsyncadd [#allocation8], 4294966272 }
 0x4a7   :  { %999 = dma.done.wait [#allocation11], 1024  }
 0x4a8   :  { %1000 = vsyncadd [#allocation11], 4294966272 }
 0x4a9   :  { %729 = vsyncpa [#allocation7], 1 }
 0x4aa   :  { %730 = vsyncpa [#allocation8], 1 }
 0x4ab   :  { %731 = vsyncpa [#allocation11], 1 }

</bundles_post_ra>
